<compile_context>
chip_gen: v5e
topology: v5e:2x2
jax: 0.10.0
libtpu: 0.0.40
codegen_flags: <defaults>
</compile_context>

<pallas_src>
import jax
import jax.numpy as jnp
from jax.experimental import pallas as pl
from jax.experimental.pallas import tpu as pltpu

EPS = 1e-5


# ---------------------------------------------------------------------------
# Pallas kernels
# ---------------------------------------------------------------------------
def _gemm_bn_relu_kernel(a_ref, w_ref, s_ref, b_ref, o_ref, acc_ref):
    """out = relu((A @ W) * scale + bias), K-axis accumulation in f32 scratch."""
    @pl.when(pl.program_id(2) == 0)
    def _():
        acc_ref[...] = jnp.zeros_like(acc_ref)

    acc_ref[...] += jnp.dot(a_ref[...], w_ref[...],
                            preferred_element_type=jnp.float32)

    @pl.when(pl.program_id(2) == pl.num_programs(2) - 1)
    def _():
        o_ref[...] = jnp.maximum(
            acc_ref[...] * s_ref[...] + b_ref[...], 0.0).astype(o_ref.dtype)


def _gemm_bn_add_relu_kernel(a_ref, w_ref, s_ref, b_ref,
                             xs_ref, wd_ref, sd_ref, bd_ref,
                             o_ref, acc_ref):
    """out = relu((A @ W) * s + b  +  (Xs @ Wd) * sd + bd)

    The residual (downsample 1x1 conv + BN, or identity) is computed in-kernel
    on the last K step, so it never round-trips through HBM.
    """
    @pl.when(pl.program_id(2) == 0)
    def _():
        acc_ref[...] = jnp.zeros_like(acc_ref)

    acc_ref[...] += jnp.dot(a_ref[...], w_ref[...],
                            preferred_element_type=jnp.float32)

    @pl.when(pl.program_id(2) == pl.num_programs(2) - 1)
    def _():
        res = jnp.dot(xs_ref[...], wd_ref[...],
                      preferred_element_type=jnp.float32)
        res = res * sd_ref[...] + bd_ref[...]
        o_ref[...] = jnp.maximum(
            acc_ref[...] * s_ref[...] + b_ref[...] + res, 0.0).astype(o_ref.dtype)


# ---------------------------------------------------------------------------
# Wrapper: padded / tiled pallas_call
# ---------------------------------------------------------------------------
def _round_up(x, m):
    return (x + m - 1) // m * m


def _pick_tile(dim, pref):
    # tile is a multiple of 128 (lane-dense), capped at `pref`, >= padded dim/1
    return min(pref, _round_up(dim, 128))


def _pad2d(a, rows, cols):
    return jnp.pad(a, ((0, rows - a.shape[0]), (0, cols - a.shape[1])))


def _fused_conv_gemm(a, w, scale, bias, residual=None, *,
                     out_dtype, tm=256, tn=256, tk=512):
    """GEMM + folded-BN (+ fused residual GEMM + BN) + ReLU.

    a:        [M, K]   im2col patches (cast to bf16)
    w:        [K, C]   conv weights   (cast to bf16)
    scale/bias: [C]    folded BatchNorm (f32, applied post-accumulation)
    residual: optional (xs [M, Cd], wd [Cd, C], sd [C], bd [C])
    """
    M, K = a.shape
    Cout = w.shape[1]

    tm = _pick_tile(M, tm)
    tn = _pick_tile(Cout, tn)
    tk = _pick_tile(K, tk)
    Mp, Kp, Np = _round_up(M, tm), _round_up(K, tk), _round_up(Cout, tn)

    a_p = _pad2d(a.astype(jnp.bfloat16), Mp, Kp)
    w_p = _pad2d(w.astype(jnp.bfloat16), Kp, Np)
    s_p = _pad2d(scale.reshape(1, -1).astype(jnp.float32), 1, Np)
    b_p = _pad2d(bias.reshape(1, -1).astype(jnp.float32), 1, Np)

    args = [a_p, w_p, s_p, b_p]
    in_specs = [
        pl.BlockSpec((tm, tk), lambda i, j, k: (i, k)),
        pl.BlockSpec((tk, tn), lambda i, j, k: (k, j)),
        pl.BlockSpec((1, tn), lambda i, j, k: (0, j)),
        pl.BlockSpec((1, tn), lambda i, j, k: (0, j)),
    ]

    out_bytes = 4 if out_dtype == jnp.float32 else 2
    flops = 2 * Mp * Kp * Np
    bytes_accessed = (a_p.size + w_p.size) * 2 \
        + (s_p.size + b_p.size) * 4 + Mp * Np * out_bytes

    if residual is None:
        kernel = _gemm_bn_relu_kernel
    else:
        xs, wd, sd, bd = residual
        Cd = xs.shape[1]
        Kd = _round_up(Cd, 128)
        xs_p = _pad2d(xs.astype(jnp.bfloat16), Mp, Kd)
        wd_p = _pad2d(wd.astype(jnp.bfloat16), Kd, Np)
        sd_p = _pad2d(sd.reshape(1, -1).astype(jnp.float32), 1, Np)
        bd_p = _pad2d(bd.reshape(1, -1).astype(jnp.float32), 1, Np)
        args += [xs_p, wd_p, sd_p, bd_p]
        in_specs += [
            pl.BlockSpec((tm, Kd), lambda i, j, k: (i, 0)),
            pl.BlockSpec((Kd, tn), lambda i, j, k: (0, j)),
            pl.BlockSpec((1, tn), lambda i, j, k: (0, j)),
            pl.BlockSpec((1, tn), lambda i, j, k: (0, j)),
        ]
        kernel = _gemm_bn_add_relu_kernel
        flops += 2 * Mp * Kd * Np
        bytes_accessed += (xs_p.size + wd_p.size) * 2 + (sd_p.size + bd_p.size) * 4

    out = pl.pallas_call(
        kernel,
        out_shape=jax.ShapeDtypeStruct((Mp, Np), out_dtype),
        grid_spec=pltpu.PrefetchScalarGridSpec(
            num_scalar_prefetch=0,
            grid=(Mp // tm, Np // tn, Kp // tk),
            in_specs=in_specs,
            out_specs=pl.BlockSpec((tm, tn), lambda i, j, k: (i, j)),
            scratch_shapes=[pltpu.VMEM((tm, tn), jnp.float32)]),
        compiler_params=pltpu.CompilerParams(
            dimension_semantics=("parallel", "parallel", "arbitrary"),
            vmem_limit_bytes=32 * 1024 * 1024),
        cost_estimate=pl.CostEstimate(flops=flops, transcendentals=0,
                                      bytes_accessed=bytes_accessed),
    )(*args)
    return out[:M, :Cout]


# ---------------------------------------------------------------------------
# Plain-JAX glue: im2col, BN folding, weight reshape, parameters
# ---------------------------------------------------------------------------
def _im2col(x_nhwc, k, stride, pad):
    xp = jnp.pad(x_nhwc, ((0, 0), (pad, pad), (pad, pad), (0, 0)))
    N, Hp, Wp, C = xp.shape
    Ho = (Hp - k) // stride + 1
    Wo = (Wp - k) // stride + 1
    cols = []
    for kh in range(k):
        for kw in range(k):
            cols.append(xp[:, kh:kh + Ho * stride:stride,
                           kw:kw + Wo * stride:stride, :])
    patches = jnp.concatenate(cols, axis=-1)          # [N, Ho, Wo, k*k*C]
    return patches.reshape(N * Ho * Wo, k * k * C), Ho, Wo


def _fold_bn(gamma, beta, rmean, rvar):
    scale = gamma / jnp.sqrt(rvar + EPS)
    bias = beta - rmean * scale
    return scale, bias


def _conv_w_to_gemm(w_oihw):
    co, ci, kh, kw = w_oihw.shape
    return jnp.transpose(w_oihw, (2, 3, 1, 0)).reshape(kh * kw * ci, co)


def init_params(key, cin, cout):
    ks = jax.random.split(key, 16)
    f32 = jnp.float32
    return {
        'w1': 0.1 * jax.random.normal(ks[0], (cout, cin, 3, 3), f32),
        'g1': 1.0 + 0.1 * jax.random.normal(ks[1], (cout,), f32),
        'b1': 0.1 * jax.random.normal(ks[2], (cout,), f32),
        'rm1': 0.1 * jax.random.normal(ks[3], (cout,), f32),
        'rv1': jax.random.uniform(ks[4], (cout,), f32, 0.5, 1.5),
        'w2': 0.1 * jax.random.normal(ks[5], (cout, cout, 3, 3), f32),
        'g2': 1.0 + 0.1 * jax.random.normal(ks[6], (cout,), f32),
        'b2': 0.1 * jax.random.normal(ks[7], (cout,), f32),
        'rm2': 0.1 * jax.random.normal(ks[8], (cout,), f32),
        'rv2': jax.random.uniform(ks[9], (cout,), f32, 0.5, 1.5),
        'wd': 0.1 * jax.random.normal(ks[10], (cout, cin, 1, 1), f32),
        'gd': 1.0 + 0.1 * jax.random.normal(ks[11], (cout,), f32),
        'bd': 0.1 * jax.random.normal(ks[12], (cout,), f32),
        'rmd': 0.1 * jax.random.normal(ks[13], (cout,), f32),
        'rvd': jax.random.uniform(ks[14], (cout,), f32, 0.5, 1.5),
    }


# ---------------------------------------------------------------------------
# ResNetBlock forward
# ---------------------------------------------------------------------------
def resnet_block_forward(x_nchw, p, stride):
    N, Cin, H, W = x_nchw.shape
    Cout = p['w1'].shape[0]
    x = jnp.transpose(x_nchw, (0, 2, 3, 1)).astype(jnp.bfloat16)   # NHWC, bf16

    # conv1 -> bn1 -> relu  (tiled fused GEMM kernel, bf16 intermediate)
    a1, Ho, Wo = _im2col(x, 3, stride, 1)
    s1, b1 = _fold_bn(p['g1'], p['b1'], p['rm1'], p['rv1'])
    y1 = _fused_conv_gemm(a1, _conv_w_to_gemm(p['w1']), s1, b1,
                          out_dtype=jnp.bfloat16)
    y1 = y1.reshape(N, Ho, Wo, Cout)

    # residual operands for the fused second kernel
    xs = x[:, ::stride, ::stride, :].reshape(-1, Cin)
    if stride != 1 or Cin != Cout:
        wd = _conv_w_to_gemm(p['wd'])
        sd, bd = _fold_bn(p['gd'], p['bd'], p['rmd'], p['rvd'])
    else:
        wd = jnp.eye(Cin, Cout, dtype=jnp.float32)   # identity path
        sd = jnp.ones((Cout,), jnp.float32)
        bd = jnp.zeros((Cout,), jnp.float32)

    # conv2 -> bn2 -> (+downsample/identity) -> relu  (single fused kernel)
    a2, _, _ = _im2col(y1, 3, 1, 1)
    s2, b2 = _fold_bn(p['g2'], p['b2'], p['rm2'], p['rv2'])
    out = _fused_conv_gemm(a2, _conv_w_to_gemm(p['w2']), s2, b2,
                           residual=(xs, wd, sd, bd),
                           out_dtype=jnp.float32)

    out = out.reshape(N, Ho, Wo, Cout)
    return jnp.transpose(out, (0, 3, 1, 2))           # back to NCHW


# ---------------------------------------------------------------------------
# Precision-matched pure-JAX reference (PyTorch forward, eval-mode BN,
# bf16 matmul operands + f32 accumulation, bf16 intermediate activation)
# ---------------------------------------------------------------------------
def reference_forward(x_nchw, p, stride):
    x = jnp.transpose(x_nchw, (0, 2, 3, 1)).astype(jnp.bfloat16)

    def conv(h, w, s, pad):
        return jax.lax.conv_general_dilated(
            h.astype(jnp.bfloat16),
            jnp.transpose(w, (2, 3, 1, 0)).astype(jnp.bfloat16),
            (s, s), [(pad, pad), (pad, pad)],
            dimension_numbers=('NHWC', 'HWIO', 'NHWC'),
            preferred_element_type=jnp.float32)

    def bn(y, g, b, rm, rv):
        scale = g / jnp.sqrt(rv + EPS)
        return y * scale + (b - rm * scale)

    out = jax.nn.relu(bn(conv(x, p['w1'], stride, 1),
                         p['g1'], p['b1'], p['rm1'], p['rv1']))
    out = out.astype(jnp.bfloat16)
    out = bn(conv(out, p['w2'], 1, 1), p['g2'], p['b2'], p['rm2'], p['rv2'])
    if stride != 1 or x.shape[-1] != p['w1'].shape[0]:
        identity = bn(conv(x, p['wd'], stride, 0),
                      p['gd'], p['bd'], p['rmd'], p['rvd'])
    else:
        identity = x.astype(jnp.float32)
    out = jax.nn.relu(out + identity)
    return jnp.transpose(out, (0, 3, 1, 2))


if __name__ == "__main__":
    key = jax.random.PRNGKey(0)
    k_x, k_p = jax.random.split(key)

    N, Cin, H, W = 2, 4, 16, 16
    Cout, stride = 8, 2

    x = jax.random.normal(k_x, (N, Cin, H, W), jnp.float32)
    params = init_params(k_p, Cin, Cout)

    out = resnet_block_forward(x, params, stride)
    out = jax.block_until_ready(out)

    ref = reference_forward(x, params, stride)
    assert out.shape == ref.shape == (N, Cout, H // stride, W // stride)
    max_err = jnp.max(jnp.abs(out - ref))
    assert jnp.allclose(out, ref, atol=2e-2, rtol=2e-2), \
        f"max abs err {max_err}"

    print("KERNEL_OK")
</pallas_src>

<mosaic_0001>
module attributes {stable_mosaic.version = 11 : i64} {
  func.func @_gemm_bn_relu_kernel(%arg0: i32, %arg1: i32, %arg2: i32, %arg3: memref<128x128xbf16, #tpu.memory_space<vmem>>, %arg4: memref<128x128xbf16, #tpu.memory_space<vmem>>, %arg5: memref<1x128xf32, #tpu.memory_space<vmem>>, %arg6: memref<1x128xf32, #tpu.memory_space<vmem>>, %arg7: memref<128x128xbf16, #tpu.memory_space<vmem>>, %arg8: memref<128x128xf32, #tpu.memory_space<vmem>>) attributes {dimension_semantics = [#tpu.dimension_semantics<parallel>, #tpu.dimension_semantics<parallel>, #tpu.dimension_semantics<arbitrary>], iteration_bounds = array<i64: 1, 1, 1>, scalar_prefetch = 0 : i64, scratch_operands = 1 : i64, tpu.core_type = #tpu.core_type<tc>, window_params = [{transform_indices = @transform_0, window_bounds = array<i64: 128, 128>}, {transform_indices = @transform_1, window_bounds = array<i64: 128, 128>}, {transform_indices = @transform_2, window_bounds = array<i64: 1, 128>}, {transform_indices = @transform_3, window_bounds = array<i64: 1, 128>}, {transform_indices = @transform_4, window_bounds = array<i64: 128, 128>}]} {
    %c0_i32 = arith.constant 0 : i32
    %0 = arith.cmpi eq, %arg2, %c0_i32 : i32
    %1 = arith.extui %0 : i1 to i32
    %c0_i32_0 = arith.constant 0 : i32
    %2 = arith.cmpi ne, %1, %c0_i32_0 : i32
    scf.if %2 {
      %cst_10 = arith.constant 0.000000e+00 : f32
      %12 = vector.broadcast %cst_10 : f32 to vector<128x128xf32>
      %c0_11 = arith.constant 0 : index
      %c0_12 = arith.constant 0 : index
      %13 = vector.load %arg8[%c0_11, %c0_12] : memref<128x128xf32, #tpu.memory_space<vmem>>, vector<128x128xf32>
      tpu.vector_store %arg8[%c0_11, %c0_12], %12 {strides = array<i32>} : memref<128x128xf32, #tpu.memory_space<vmem>>, vector<128x128xf32>,
    } else {
    }
    %c0 = arith.constant 0 : index
    %c0_1 = arith.constant 0 : index
    %3 = vector.load %arg8[%c0, %c0_1] : memref<128x128xf32, #tpu.memory_space<vmem>>, vector<128x128xf32>
    %c0_2 = arith.constant 0 : index
    %c0_3 = arith.constant 0 : index
    %4 = vector.load %arg3[%c0_2, %c0_3] : memref<128x128xbf16, #tpu.memory_space<vmem>>, vector<128x128xbf16>
    %c0_4 = arith.constant 0 : index
    %c0_5 = arith.constant 0 : index
    %5 = vector.load %arg4[%c0_4, %c0_5] : memref<128x128xbf16, #tpu.memory_space<vmem>>, vector<128x128xbf16>
    %cst = arith.constant dense<0.000000e+00> : vector<128x128xf32>
    %6 = tpu.matmul %4, %5, %cst {dimension_numbers = #tpu.dot_dimension_numbers<[1], [0], [0], [1], [0, 0, 1, 1], [], []>} : vector<128x128xbf16>, vector<128x128xbf16>, vector<128x128xf32> -> vector<128x128xf32>
    %7 = arith.addf %3, %6 : vector<128x128xf32>
    %c0_6 = arith.constant 0 : index
    %c0_7 = arith.constant 0 : index
    %8 = vector.load %arg8[%c0_6, %c0_7] : memref<128x128xf32, #tpu.memory_space<vmem>>, vector<128x128xf32>
    tpu.vector_store %arg8[%c0_6, %c0_7], %7 {strides = array<i32>} : memref<128x128xf32, #tpu.memory_space<vmem>>, vector<128x128xf32>,
    %c0_i32_8 = arith.constant 0 : i32
    %9 = arith.cmpi eq, %arg2, %c0_i32_8 : i32
    %10 = arith.extui %9 : i1 to i32
    %c0_i32_9 = arith.constant 0 : i32
    %11 = arith.cmpi ne, %10, %c0_i32_9 : i32
    scf.if %11 {
      %c0_10 = arith.constant 0 : index
      %c0_11 = arith.constant 0 : index
      %12 = vector.load %arg8[%c0_10, %c0_11] : memref<128x128xf32, #tpu.memory_space<vmem>>, vector<128x128xf32>
      %c0_12 = arith.constant 0 : index
      %c0_13 = arith.constant 0 : index
      %13 = vector.load %arg5[%c0_12, %c0_13] : memref<1x128xf32, #tpu.memory_space<vmem>>, vector<1x128xf32>
      %14 = vector.broadcast %13 : vector<1x128xf32> to vector<128x128xf32>
      %15 = arith.mulf %12, %14 : vector<128x128xf32>
      %c0_14 = arith.constant 0 : index
      %c0_15 = arith.constant 0 : index
      %16 = vector.load %arg6[%c0_14, %c0_15] : memref<1x128xf32, #tpu.memory_space<vmem>>, vector<1x128xf32>
      %17 = vector.broadcast %16 : vector<1x128xf32> to vector<128x128xf32>
      %18 = arith.addf %15, %17 : vector<128x128xf32>
      %cst_16 = arith.constant 0.000000e+00 : f32
      %19 = vector.broadcast %cst_16 : f32 to vector<128x128xf32>
      %20 = arith.maximumf %18, %19 : vector<128x128xf32>
      %21 = arith.truncf %20 : vector<128x128xf32> to vector<128x128xbf16>
      %c0_17 = arith.constant 0 : index
      %c0_18 = arith.constant 0 : index
      %22 = vector.load %arg7[%c0_17, %c0_18] : memref<128x128xbf16, #tpu.memory_space<vmem>>, vector<128x128xbf16>
      tpu.vector_store %arg7[%c0_17, %c0_18], %21 {strides = array<i32>} : memref<128x128xbf16, #tpu.memory_space<vmem>>, vector<128x128xbf16>,
    } else {
    }
    return
  }
  func.func @transform_0(%arg0: i32, %arg1: i32, %arg2: i32) -> (i32, i32) {
    %c0_i32 = arith.constant 0 : i32
    return %arg0, %arg2 : i32, i32
  }
  func.func @transform_1(%arg0: i32, %arg1: i32, %arg2: i32) -> (i32, i32) {
    %c0_i32 = arith.constant 0 : i32
    return %arg2, %arg1 : i32, i32
  }
  func.func @transform_2(%arg0: i32, %arg1: i32, %arg2: i32) -> (i32, i32) {
    %c0_i32 = arith.constant 0 : i32
    %c0_i32_0 = arith.constant 0 : i32
    return %c0_i32, %arg1 : i32, i32
  }
  func.func @transform_3(%arg0: i32, %arg1: i32, %arg2: i32) -> (i32, i32) {
    %c0_i32 = arith.constant 0 : i32
    %c0_i32_0 = arith.constant 0 : i32
    return %c0_i32, %arg1 : i32, i32
  }
  func.func @transform_4(%arg0: i32, %arg1: i32, %arg2: i32) -> (i32, i32) {
    %c0_i32 = arith.constant 0 : i32
    return %arg0, %arg1 : i32, i32
  }
}

</mosaic_0001>

<bundles_post_ra>
// kernel: tpu_custom_call.1
= control target key start
LH: loop header
LB: loop body
LE: loop exit
PB: predicated region body
PF: predicated region fallthrough
CT: control target
= control target key end

     0   :  { %9 = vsyncpa [#allocation4], 0  ;;  %s748_s0 = inlined_call_operand.hbm [shape: bf16[128,128], index: 0, kind: input, shape index: {}]   ;;  %s749_s1 = inlined_call_operand.hbm [shape: bf16[128,128], index: 1, kind: input, shape index: {}]   ;;  %s750_s2 = inlined_call_operand.vmem [shape: f32[1,128], index: 2, kind: input, shape index: {}]   ;;  %s751_s3 = inlined_call_operand.vmem [shape: f32[1,128], index: 3, kind: input, shape index: {}]   ;;  %s752_s4 = inlined_call_operand.hbm [shape: bf16[128,128], index: 4, kind: output, shape index: {}]  }
   0x1   :  { %10 = vsyncpa [#allocation7], 0 }
   0x2   :  { %11 = vsyncpa [#allocation5], 0  ;;  %s16_s17 = sshll.u32 %s748_s0, 4  ;;  %s658_s18 = smov [#allocation3]   ;;  %s17_s17 = int_to_ptr.hbm [resolvable:$true] %s16_s17 }
   0x3   :  { %s18_s19 = sshll.u32 %s658_s18, 4  ;;  %s29_s22 = sshll.u32 %s749_s1, 4  ;;  %s19_s19 = int_to_ptr.vmem [resolvable:$true] %s18_s19  ;;  %s30_s22 = int_to_ptr.hbm [resolvable:$true] %s29_s22 }
   0x4   :  { %s659_s23 = smov 64   ;;  %s660_s24 = smov 4  }
   0x5   :  { %24 = dma.hbm_to_vmem [thread:$0]  %s17_s17, 1024, %s19_s19, [#allocation4], %s659_s23, %s659_s23, %s660_s24  }
   0x6   :  { %s661_s25 = smov [#allocation6]  }
   0x7   :  { %s31_s26 = sshll.u32 %s661_s25, 4  ;;  %s32_s26 = int_to_ptr.vmem [resolvable:$true] %s31_s26 }
   0x8   :  { %37 = dma.hbm_to_vmem [thread:$0]  %s30_s22, 1024, %s32_s26, [#allocation7], %s659_s23, %s659_s23, %s660_s24  }
   0x9   :  { %652 = dma.done.wait [#allocation4], 1024  }
   0xa   :  { %653 = vsyncadd [#allocation4], 4294966272 }
   0xb   :  { %654 = dma.done.wait [#allocation7], 1024  }
   0xc   :  { %655 = vsyncadd [#allocation7], 4294966272  ;;  %v501_v0 = vld [vmem:[#allocation6 + $0x38] sm:$0xff]  ;;  %v500_v1 = vld [vmem:[#allocation6 + $0x30] sm:$0xff]  ;;  %s408_s5 = sshll.u32 %s752_s4, 4  ;;  %s409_s5 = int_to_ptr.hbm [resolvable:$true] %s408_s5 }
   0xd   :  { %214 = vmatpush.bf16.msra.mxu0 %v501_v0  ;;  %549 = vmatpush.bf16.msra.mxu1 %v501_v0  ;;  %v499_v2 = vld [vmem:[#allocation6 + $0x28] sm:$0xff]  ;;  %v498_v3 = vld [vmem:[#allocation6 + $0x20] sm:$0xff]  ;;  %v497_v4 = vld [vmem:[#allocation6 + $0x18] sm:$0xff] }
   0xe   :  { %550 = vmatpush.bf16.msra.mxu2 %v501_v0  ;;  %551 = vmatpush.bf16.msra.mxu3 %v501_v0  ;;  %v496_v5 = vld [vmem:[#allocation6 + $0x10] sm:$0xff]  ;;  %v495_v6 = vld [vmem:[#allocation6 + $0x8] sm:$0xff]  ;;  %v494_v7 = vld [vmem:[#allocation6] sm:$0xff] }
   0xf   :  { %v486_v8 = vld [vmem:[#allocation3] sm:$0xff]  ;;  %v488_v9 = vld [vmem:[#allocation3 + $0x10] sm:$0xff]  ;;  %v487_v12 = vld [vmem:[#allocation3 + $0x8] sm:$0xff] }
  0x10   :  { %v490_v10 = vld [vmem:[#allocation3 + $0x20] sm:$0xff]  ;;  %v492_v11 = vld [vmem:[#allocation3 + $0x30] sm:$0xff]  ;;  %v489_v13 = vld [vmem:[#allocation3 + $0x18] sm:$0xff] }
  0x11   :  { %215 = vmatpush.bf16.msra.mxu0 %v500_v1  ;;  %552 = vmatpush.bf16.msra.mxu1 %v500_v1  ;;  %v491_v14 = vld [vmem:[#allocation3 + $0x28] sm:$0xff]  ;;  %v493_v15 = vld [vmem:[#allocation3 + $0x38] sm:$0xff]  ;;  %v703_v18 = vld [vmem:[%s750_s2] ss:$0 sm:$0xff]  ;;  %s662_s2 = smov [#allocation8]  }
  0x12   :  { %553 = vmatpush.bf16.msra.mxu2 %v500_v1  ;;  %554 = vmatpush.bf16.msra.mxu3 %v500_v1  ;;  %v709_v20 = vld [vmem:[%s751_s3] ss:$0 sm:$0xff]  ;;  %s406_s3 = sshll.u32 %s662_s2, 4  ;;  %s407_s3 = int_to_ptr.vmem [resolvable:$true] %s406_s3 }
  0x15   :  { %216 = vmatpush.bf16.msra.mxu0 %v499_v2  ;;  %555 = vmatpush.bf16.msra.mxu1 %v499_v2 }
  0x16   :  { %556 = vmatpush.bf16.msra.mxu2 %v499_v2  ;;  %557 = vmatpush.bf16.msra.mxu3 %v499_v2 }
  0x19   :  { %217 = vmatpush.bf16.msra.mxu0 %v498_v3  ;;  %558 = vmatpush.bf16.msra.mxu1 %v498_v3 }
  0x1a   :  { %559 = vmatpush.bf16.msra.mxu2 %v498_v3  ;;  %560 = vmatpush.bf16.msra.mxu3 %v498_v3 }
  0x1d   :  { %218 = vmatpush.bf16.msra.mxu0 %v497_v4  ;;  %561 = vmatpush.bf16.msra.mxu1 %v497_v4 }
  0x1e   :  { %562 = vmatpush.bf16.msra.mxu2 %v497_v4  ;;  %563 = vmatpush.bf16.msra.mxu3 %v497_v4 }
  0x21   :  { %219 = vmatpush.bf16.msra.mxu0 %v496_v5  ;;  %564 = vmatpush.bf16.msra.mxu1 %v496_v5 }
  0x22   :  { %565 = vmatpush.bf16.msra.mxu2 %v496_v5  ;;  %566 = vmatpush.bf16.msra.mxu3 %v496_v5 }
  0x25   :  { %220 = vmatpush.bf16.msra.mxu0 %v495_v6  ;;  %567 = vmatpush.bf16.msra.mxu1 %v495_v6 }
  0x26   :  { %568 = vmatpush.bf16.msra.mxu2 %v495_v6  ;;  %569 = vmatpush.bf16.msra.mxu3 %v495_v6 }
  0x29   :  { %221 = vmatpush.bf16.msra.mxu0 %v494_v7  ;;  %570 = vmatpush.bf16.msra.mxu1 %v494_v7 }
  0x2a   :  { %571 = vmatpush.bf16.msra.mxu2 %v494_v7  ;;  %572 = vmatpush.bf16.msra.mxu3 %v494_v7 }
  0x2c   :  { %222 = vmatmul.bf16.vlgmr.msra.gmra.mxu0 %v486_v8  ;;  %232 = vmatmul.bf16.vlgmr.msra.gmra.mxu1 %v488_v9 }
  0x2d   :  { %242 = vmatmul.bf16.vlgmr.msra.gmra.mxu2 %v490_v10  ;;  %252 = vmatmul.bf16.vlgmr.msra.gmra.mxu3 %v492_v11 }
  0x3c   :  { %227 = vmatmul.bf16.gmra.mxu0 %v487_v12  ;;  %237 = vmatmul.bf16.gmra.mxu1 %v489_v13 }
  0x3d   :  { %247 = vmatmul.bf16.gmra.mxu2 %v491_v14  ;;  %257 = vmatmul.bf16.gmra.mxu3 %v493_v15 }
  0xa9   :  { %v223_v16 = vpop.f32.mrf.mxu0  ;;  %v233_v17 = vpop.f32.mrf.mxu1 }
  0xaa   :  { %v318_v19 = vmul.f32 %v703_v18, %v223_v16  ;;  %v322_v21 = vmul.f32 %v703_v18, %v233_v17 }
  0xac   :  { %v338_v26 = vadd.f32 %v709_v20, %v318_v19  ;;  %v342_v27 = vadd.f32 %v709_v20, %v322_v21 }
  0xae   :  { %v354_v34 = vmax.f32 %v338_v26, 0.0  ;;  %v358_v35 = vmax.f32 %v342_v27, 0.0 }
  0xb0   :  { %v243_v22 = vpop.f32.mrf.mxu2  ;;  %v253_v23 = vpop.f32.mrf.mxu3 }
  0xb1   :  { %v225_v24 = vpop.f32.mrf.mxu0  ;;  %v235_v25 = vpop.f32.mrf.mxu1  ;;  %v326_v32 = vmul.f32 %v703_v18, %v243_v22  ;;  %v330_v33 = vmul.f32 %v703_v18, %v253_v23 }
  0xb2   :  { %v319_v28 = vmul.f32 %v703_v18, %v225_v24  ;;  %v323_v29 = vmul.f32 %v703_v18, %v235_v25 }
  0xb3   :  { %v346_v42 = vadd.f32 %v709_v20, %v326_v32  ;;  %v350_v43 = vadd.f32 %v709_v20, %v330_v33 }
  0xb4   :  { %v339_v30 = vadd.f32 %v709_v20, %v319_v28  ;;  %v343_v31 = vadd.f32 %v709_v20, %v323_v29 }
  0xb5   :  { %v362_v50 = vmax.f32 %v346_v42, 0.0  ;;  %v366_v51 = vmax.f32 %v350_v43, 0.0 }
  0xb6   :  { %v355_v36 = vmax.f32 %v339_v30, 0.0  ;;  %v359_v37 = vmax.f32 %v343_v31, 0.0 }
  0xb8   :  { %v505_v38 = vpack.c.bf16 %v355_v36, %v354_v34  ;;  %v515_v39 = vpack.c.bf16 %v359_v37, %v358_v35  ;;  %v245_v40 = vpop.f32.mrf.mxu2  ;;  %v255_v41 = vpop.f32.mrf.mxu3 }
  0xb9   :  { %v327_v44 = vmul.f32 %v703_v18, %v245_v40  ;;  %v331_v45 = vmul.f32 %v703_v18, %v255_v41  ;;  %v228_v46 = vpop.f32.mrf.mxu0  ;;  %v238_v47 = vpop.f32.mrf.mxu1 }
  0xba   :  { %506 = vst [vmem:[#allocation8] sm:$0xff] %v505_v38   ;;  %v320_v54 = vmul.f32 %v703_v18, %v228_v46  ;;  %v324_v55 = vmul.f32 %v703_v18, %v238_v47 }
  0xbb   :  { %543 = vst [vmem:[#allocation8 + $0x10] sm:$0xff] %v515_v39   ;;  %v347_v48 = vadd.f32 %v709_v20, %v327_v44  ;;  %v351_v49 = vadd.f32 %v709_v20, %v331_v45 }
  0xbc   :  { %v340_v62 = vadd.f32 %v709_v20, %v320_v54  ;;  %v344_v63 = vadd.f32 %v709_v20, %v324_v55 }
  0xbd   :  { %v363_v52 = vmax.f32 %v347_v48, 0.0  ;;  %v367_v53 = vmax.f32 %v351_v49, 0.0 }
  0xbe   :  { %v356_v6 = vmax.f32 %v340_v62, 0.0  ;;  %v360_v7 = vmax.f32 %v344_v63, 0.0 }
  0xbf   :  { %v525_v56 = vpack.c.bf16 %v363_v52, %v362_v50  ;;  %v535_v57 = vpack.c.bf16 %v367_v53, %v366_v51 }
  0xc0   :  { %v248_v58 = vpop.f32.mrf.mxu2  ;;  %v258_v59 = vpop.f32.mrf.mxu3 }
  0xc1   :  { %545 = vst [vmem:[#allocation8 + $0x20] sm:$0xff] %v525_v56   ;;  %v230_v60 = vpop.f32.mrf.mxu0  ;;  %v240_v61 = vpop.f32.mrf.mxu1  ;;  %v328_v4 = vmul.f32 %v703_v18, %v248_v58  ;;  %v332_v5 = vmul.f32 %v703_v18, %v258_v59 }
  0xc2   :  { %547 = vst [vmem:[#allocation8 + $0x30] sm:$0xff] %v535_v57   ;;  %v321_v0 = vmul.f32 %v703_v18, %v230_v60  ;;  %v325_v1 = vmul.f32 %v703_v18, %v240_v61 }
  0xc3   :  { %v348_v14 = vadd.f32 %v709_v20, %v328_v4  ;;  %v352_v15 = vadd.f32 %v709_v20, %v332_v5 }
  0xc4   :  { %v341_v2 = vadd.f32 %v709_v20, %v321_v0  ;;  %v345_v3 = vadd.f32 %v709_v20, %v325_v1 }
  0xc5   :  { %v364_v22 = vmax.f32 %v348_v14, 0.0  ;;  %v368_v23 = vmax.f32 %v352_v15, 0.0 }
  0xc6   :  { %v357_v8 = vmax.f32 %v341_v2, 0.0  ;;  %v361_v9 = vmax.f32 %v345_v3, 0.0 }
  0xc8   :  { %v510_v10 = vpack.c.bf16 %v357_v8, %v356_v6  ;;  %v520_v11 = vpack.c.bf16 %v361_v9, %v360_v7  ;;  %v250_v12 = vpop.f32.mrf.mxu2  ;;  %v260_v13 = vpop.f32.mrf.mxu3 }
  0xc9   :  { %v329_v16 = vmul.f32 %v703_v18, %v250_v12  ;;  %v333_v17 = vmul.f32 %v703_v18, %v260_v13 }
  0xca   :  { %542 = vst [vmem:[#allocation8 + $0x8] sm:$0xff] %v510_v10  }
  0xcb   :  { %544 = vst [vmem:[#allocation8 + $0x18] sm:$0xff] %v520_v11   ;;  %v349_v19 = vadd.f32 %v709_v20, %v329_v16  ;;  %v353_v21 = vadd.f32 %v709_v20, %v333_v17 }
  0xcd   :  { %v365_v24 = vmax.f32 %v349_v19, 0.0  ;;  %v369_v25 = vmax.f32 %v353_v21, 0.0 }
  0xcf   :  { %v530_v26 = vpack.c.bf16 %v365_v24, %v364_v22  ;;  %v540_v27 = vpack.c.bf16 %v369_v25, %v368_v23 }
  0xd1   :  { %546 = vst [vmem:[#allocation8 + $0x28] sm:$0xff] %v530_v26  }
  0xd2   :  { %548 = vst [vmem:[#allocation8 + $0x38] sm:$0xff] %v540_v27  }
  0xd3   :  { %414 = dma.vmem_to_hbm [thread:$0]  %s407_s3, 1024, %s409_s5, [#allocation5], %s659_s23, %s659_s23, %s660_s24  }
  0xd4   :  { %656 = dma.done.wait [#allocation5], 1024  }
  0xd5   :  { %657 = vsyncadd [#allocation5], 4294966272 }
  0xd6   :  { %419 = vsyncpa [#allocation4], 1 }
  0xd7   :  { %420 = vsyncpa [#allocation7], 1 }
  0xd8   :  { %421 = vsyncpa [#allocation5], 1 }

</bundles_post_ra>
